<compile_context>
chip_gen: v5e
topology: v5e:2x2
jax: 0.10.0
libtpu: 0.0.40
codegen_flags: <defaults>
</compile_context>

<pallas_src>
import functools

import jax
import jax.numpy as jnp
from jax.experimental import pallas as pl

DROPOUT_P = 0.5  # MC-dropout probability of the synthetic BayesianModule


def _sampler_kernel(x_ref, w1_ref, b1_ref, w2_ref, b2_ref, mask_ref, out_ref,
                    *, num_samples):
    B, C = out_ref.shape
    H = w1_ref.shape[1]

    # ---- layer 1 (K-invariant): computed exactly once --------------------
    h = jnp.dot(x_ref[...], w1_ref[...], preferred_element_type=jnp.float32)
    h = jnp.maximum(h + b1_ref[...], 0.0)                        # (B, H)

    # ---- MC dropout: apply all K precomputed inverted-dropout masks ------
    hk = mask_ref[...] * h[None, :, :]                           # (K, B, H)
    hk = hk.reshape(num_samples * B, H)                          # (K*B, H)

    # ---- layer 2: one batched MXU call for all K samples -----------------
    logits = jnp.dot(hk, w2_ref[...], preferred_element_type=jnp.float32)
    logits = logits + b2_ref[...]                                # (K*B, C)

    # ---- softmax over classes (exp(log_softmax(x)) == softmax(x)) --------
    m = jnp.max(logits, axis=-1, keepdims=True)
    e = jnp.exp(logits - m)
    probs = e / jnp.sum(e, axis=-1, keepdims=True)               # (K*B, C)

    # ---- SamplerModel eval path: log(mean over K of probs) ---------------
    # TODO(synk): PyTorch accumulates in float64; TPU Pallas has no f64, so
    # the K-sample reduction is done in float32.
    mean_probs = jnp.sum(probs.reshape(num_samples, B, C), axis=0)
    out_ref[...] = jnp.log(mean_probs * (1.0 / num_samples))


def sampler_model_forward(x, params, *, k, seed=0):
    """log(mean over k MC-dropout samples of softmax(net(x)))  -> (B, C)."""
    w1, b1, w2, b2 = params
    B, D = x.shape
    H = w1.shape[1]
    C = w2.shape[1]

    # Inverted-dropout masks for all K MC samples, drawn outside the kernel
    # (deterministic, portable; avoids the TPU-only stateful PRNG which has
    # no interpret/CPU lowering).
    keep = jax.random.bernoulli(jax.random.PRNGKey(seed),
                                p=1.0 - DROPOUT_P, shape=(k, B, H))
    mask = keep.astype(jnp.float32) * (1.0 / (1.0 - DROPOUT_P))

    kernel = functools.partial(_sampler_kernel, num_samples=k)

    # Single kernel invocation (empty grid): all operands are tiny and live
    # whole in VMEM; K is handled inside the body, so there is no per-grid-
    # step pipeline overhead and no cross-step accumulator scratch.
    return pl.pallas_call(
        kernel,
        out_shape=jax.ShapeDtypeStruct((B, C), jnp.float32),
        in_specs=[
            pl.BlockSpec((B, D), lambda: (0, 0)),        # x
            pl.BlockSpec((D, H), lambda: (0, 0)),        # W1
            pl.BlockSpec((1, H), lambda: (0, 0)),        # b1
            pl.BlockSpec((H, C), lambda: (0, 0)),        # W2
            pl.BlockSpec((1, C), lambda: (0, 0)),        # b2
            pl.BlockSpec((k, B, H), lambda: (0, 0, 0)),  # dropout masks
        ],
        out_specs=pl.BlockSpec((B, C), lambda: (0, 0)),
    )(x, w1, b1.reshape(1, H), w2, b2.reshape(1, C), mask)


def init_params(key, in_features, hidden, num_classes):
    k1, k2, k3, k4 = jax.random.split(key, 4)
    w1 = jax.random.normal(k1, (in_features, hidden), jnp.float32) * 0.1
    b1 = jax.random.normal(k2, (hidden,), jnp.float32) * 0.01
    w2 = jax.random.normal(k3, (hidden, num_classes), jnp.float32) * 0.1
    b2 = jax.random.normal(k4, (num_classes,), jnp.float32) * 0.01
    return w1, b1, w2, b2


if __name__ == "__main__":
    B, D, H, C = 8, 32, 64, 16     # batch, in_features, hidden, num_classes
    K = 8                          # number of MC-dropout samples

    key = jax.random.PRNGKey(0)
    kx, kp = jax.random.split(key)
    x = jax.random.normal(kx, (B, D), jnp.float32)
    params = init_params(kp, D, H, C)

    out = sampler_model_forward(x, params, k=K, seed=0)
    out = jax.block_until_ready(out)

    assert out.shape == (B, C)
    assert bool(jnp.all(jnp.isfinite(out)))
    # sanity: output is a log of a mean of probability vectors -> logsumexp ~ 0
    assert bool(jnp.all(jnp.abs(jax.nn.logsumexp(out, axis=-1)) < 1e-3))

    print("KERNEL_OK")
</pallas_src>

<mosaic_0001>
module attributes {stable_mosaic.version = 11 : i64} {
  func.func @_sampler_kernel(%arg0: memref<8x32xf32, #tpu.memory_space<vmem>>, %arg1: memref<32x64xf32, #tpu.memory_space<vmem>>, %arg2: memref<1x64xf32, #tpu.memory_space<vmem>>, %arg3: memref<64x16xf32, #tpu.memory_space<vmem>>, %arg4: memref<1x16xf32, #tpu.memory_space<vmem>>, %arg5: memref<8x8x64xf32, #tpu.memory_space<vmem>>, %arg6: memref<8x16xf32, #tpu.memory_space<vmem>>) attributes {dimension_semantics = [], scalar_prefetch = 0 : i64, scratch_operands = 0 : i64, tpu.core_type = #tpu.core_type<tc>} {
    %c0 = arith.constant 0 : index
    %c0_0 = arith.constant 0 : index
    %0 = vector.load %arg0[%c0, %c0_0] : memref<8x32xf32, #tpu.memory_space<vmem>>, vector<8x32xf32>
    %c0_1 = arith.constant 0 : index
    %c0_2 = arith.constant 0 : index
    %1 = vector.load %arg1[%c0_1, %c0_2] : memref<32x64xf32, #tpu.memory_space<vmem>>, vector<32x64xf32>
    %cst = arith.constant dense<0.000000e+00> : vector<8x64xf32>
    %2 = tpu.matmul %0, %1, %cst {dimension_numbers = #tpu.dot_dimension_numbers<[1], [0], [0], [1], [0, 0, 1, 1], [], []>} : vector<8x32xf32>, vector<32x64xf32>, vector<8x64xf32> -> vector<8x64xf32>
    %c0_3 = arith.constant 0 : index
    %c0_4 = arith.constant 0 : index
    %3 = vector.load %arg2[%c0_3, %c0_4] : memref<1x64xf32, #tpu.memory_space<vmem>>, vector<1x64xf32>
    %4 = vector.broadcast %3 : vector<1x64xf32> to vector<8x64xf32>
    %5 = arith.addf %2, %4 : vector<8x64xf32>
    %cst_5 = arith.constant 0.000000e+00 : f32
    %6 = vector.broadcast %cst_5 : f32 to vector<8x64xf32>
    %7 = arith.maximumf %5, %6 : vector<8x64xf32>
    %c0_6 = arith.constant 0 : index
    %c0_7 = arith.constant 0 : index
    %c0_8 = arith.constant 0 : index
    %8 = vector.load %arg5[%c0_6, %c0_7, %c0_8] : memref<8x8x64xf32, #tpu.memory_space<vmem>>, vector<8x8x64xf32>
    %9 = vector.shape_cast %7 : vector<8x64xf32> to vector<1x8x64xf32>
    %10 = vector.broadcast %9 : vector<1x8x64xf32> to vector<8x8x64xf32>
    %11 = arith.mulf %8, %10 : vector<8x8x64xf32>
    %12 = vector.shape_cast %11 : vector<8x8x64xf32> to vector<64x64xf32>
    %c0_9 = arith.constant 0 : index
    %c0_10 = arith.constant 0 : index
    %13 = vector.load %arg3[%c0_9, %c0_10] : memref<64x16xf32, #tpu.memory_space<vmem>>, vector<64x16xf32>
    %cst_11 = arith.constant dense<0.000000e+00> : vector<64x16xf32>
    %14 = tpu.matmul %12, %13, %cst_11 {dimension_numbers = #tpu.dot_dimension_numbers<[1], [0], [0], [1], [0, 0, 1, 1], [], []>} : vector<64x64xf32>, vector<64x16xf32>, vector<64x16xf32> -> vector<64x16xf32>
    %c0_12 = arith.constant 0 : index
    %c0_13 = arith.constant 0 : index
    %15 = vector.load %arg4[%c0_12, %c0_13] : memref<1x16xf32, #tpu.memory_space<vmem>>, vector<1x16xf32>
    %16 = vector.broadcast %15 : vector<1x16xf32> to vector<64x16xf32>
    %17 = arith.addf %14, %16 : vector<64x16xf32>
    %cst_14 = arith.constant dense<0xFF800000> : vector<64xf32>
    %18 = vector.multi_reduction <maximumf>, %17, %cst_14 [1] : vector<64x16xf32> to vector<64xf32>
    %19 = vector.shape_cast %18 : vector<64xf32> to vector<64x1xf32>
    %20 = vector.broadcast %19 : vector<64x1xf32> to vector<64x16xf32>
    %21 = arith.subf %17, %20 : vector<64x16xf32>
    %22 = math.exp %21 : vector<64x16xf32>
    %cst_15 = arith.constant dense<0.000000e+00> : vector<64xf32>
    %23 = vector.multi_reduction <add>, %22, %cst_15 [1] : vector<64x16xf32> to vector<64xf32>
    %24 = vector.shape_cast %23 : vector<64xf32> to vector<64x1xf32>
    %25 = vector.broadcast %24 : vector<64x1xf32> to vector<64x16xf32>
    %26 = arith.divf %22, %25 : vector<64x16xf32>
    %27 = vector.shape_cast %26 : vector<64x16xf32> to vector<8x8x16xf32>
    %cst_16 = arith.constant dense<0.000000e+00> : vector<8x16xf32>
    %28 = vector.multi_reduction <add>, %27, %cst_16 [0] : vector<8x8x16xf32> to vector<8x16xf32>
    %cst_17 = arith.constant 1.250000e-01 : f32
    %29 = vector.broadcast %cst_17 : f32 to vector<8x16xf32>
    %30 = arith.mulf %28, %29 : vector<8x16xf32>
    %31 = math.log %30 : vector<8x16xf32>
    %c0_18 = arith.constant 0 : index
    %c0_19 = arith.constant 0 : index
    %32 = vector.load %arg6[%c0_18, %c0_19] : memref<8x16xf32, #tpu.memory_space<vmem>>, vector<8x16xf32>
    tpu.vector_store %arg6[%c0_18, %c0_19], %31 {strides = array<i32>} : memref<8x16xf32, #tpu.memory_space<vmem>>, vector<8x16xf32>,
    return
  }
}

</mosaic_0001>

<bundles_post_ra>
// kernel: tpu_custom_call.1
= control target key start
LH: loop header
LB: loop body
LE: loop exit
PB: predicated region body
PF: predicated region fallthrough
CT: control target
= control target key end

     0   :  { %11 = vsyncpa [#allocation3], 0  ;;  %s746_s0 = inlined_call_operand.vmem [shape: f32[8,32], index: 0, kind: input, shape index: {}]   ;;  %s747_s1 = inlined_call_operand.hbm [shape: f32[32,64], index: 1, kind: input, shape index: {}]   ;;  %s748_s2 = inlined_call_operand.vmem [shape: f32[1,64], index: 2, kind: input, shape index: {}]   ;;  %s749_s3 = inlined_call_operand.vmem [shape: f32[64,16], index: 3, kind: input, shape index: {}]   ;;  %s750_s4 = inlined_call_operand.vmem [shape: f32[1,16], index: 4, kind: input, shape index: {}]   ;;  %s751_s5 = inlined_call_operand.vmem [shape: f32[8,8,64], index: 5, kind: input, shape index: {}]   ;;  %s752_s6 = inlined_call_operand.hbm [shape: f32[8,16], index: 6, kind: output, shape index: {}]  }
   0x1   :  { %12 = vsyncpa [#allocation4], 0  ;;  %s19_s23 = sshll.u32 %s747_s1, 4  ;;  %s522_s24 = smov [#allocation2]   ;;  %s20_s23 = int_to_ptr.hbm [resolvable:$true] %s19_s23 }
   0x2   :  { %s21_s25 = sshll.u32 %s522_s24, 4  ;;  %s523_s26 = smov 128   ;;  %s22_s25 = int_to_ptr.vmem [resolvable:$true] %s21_s25 }
   0x3   :  { %s524_s27 = smov 8  }
   0x4   :  { %27 = dma.hbm_to_vmem [thread:$0]  %s20_s23, 512, %s22_s25, [#allocation3], %s523_s26, %s523_s26, %s524_s27  }
   0x5   :  { %518 = dma.done.wait [#allocation3], 512  }
   0x6   :  { %519 = vsyncadd [#allocation3], 4294966784  ;;  %v44_v0 = vld [vmem:[#allocation2 + $0x18] sm:$0xff]  ;;  %v43_v1 = vld [vmem:[#allocation2 + $0x10] sm:$0xff]  ;;  %vm49_vm0 = vcmask 261120   ;;  %vm102_vm1 = vcmask 523264  }
   0x7   :  { %65 = vmatpush.msra.mxu0 %v44_v0  ;;  %v97_v2 = vld [vmem:[%s749_s3 + $0x38] sm:$0xff]  ;;  %v42_v3 = vld [vmem:[#allocation2 + $0x8] sm:$0xff]  ;;  %v96_v4 = vld [vmem:[%s749_s3 + $0x30] sm:$0xff]  ;;  %vm168_vm2 = vcmask 130048   ;;  %s387_s14 = sshll.u32 %s752_s6, 4  ;;  %s388_s14 = int_to_ptr.hbm [resolvable:$true] %s387_s14 }
   0x8   :  { %406 = vmatpush.msra.mxu1 %v97_v2  ;;  %407 = vmatpush.msra.mxu2 %v97_v2  ;;  %v95_v5 = vld [vmem:[%s749_s3 + $0x28] sm:$0xff]  ;;  %v41_v6 = vld [vmem:[#allocation2] sm:$0xff]  ;;  %v93_v9 = vld [vmem:[%s749_s3 + $0x18] sm:$0xff] }
   0x9   :  { %66 = vmatpush.msra.mxu0 %v43_v1  ;;  %408 = vmatpush.msra.mxu3 %v97_v2  ;;  %v40_v7 = vld [vmem:[%s746_s0] sm:$0xff]  ;;  %v92_v10 = vld [vmem:[%s749_s3 + $0x10] sm:$0xff]  ;;  %v91_v11 = vld [vmem:[%s749_s3 + $0x8] sm:$0xff] }
   0xa   :  { %409 = vmatpush.msra.mxu1 %v96_v4  ;;  %410 = vmatpush.msra.mxu2 %v96_v4  ;;  %v94_v8 = vld [vmem:[%s749_s3 + $0x20] sm:$0xff]  ;;  %v75_v17 = vld [vmem:[%s751_s5 + $0x8] sm:$0xff]  ;;  %v77_v18 = vld [vmem:[%s751_s5 + $0x18] sm:$0xff] }
   0xb   :  { %67 = vmatpush.msra.mxu0 %v42_v3  ;;  %411 = vmatpush.msra.mxu3 %v96_v4  ;;  %v90_v12 = vld [vmem:[%s749_s3] sm:$0xff]  ;;  %v79_v19 = vld [vmem:[%s751_s5 + $0x28] sm:$0xff]  ;;  %v76_v25 = vld [vmem:[%s751_s5 + $0x10] sm:$0xff] }
   0xc   :  { %412 = vmatpush.msra.mxu1 %v95_v5  ;;  %413 = vmatpush.msra.mxu2 %v95_v5  ;;  %v434_v13 = vld [vmem:[%s748_s2] ss:$0 sm:$0xff]  ;;  %v80_v27 = vld [vmem:[%s751_s5 + $0x30] sm:$0xff]  ;;  %v81_v31 = vld [vmem:[%s751_s5 + $0x38] sm:$0xff] }
   0xd   :  { %68 = vmatpush.msra.mxu0 %v41_v6  ;;  %414 = vmatpush.msra.mxu3 %v95_v5  ;;  %v74_v16 = vld [vmem:[%s751_s5] sm:$0xff] }
   0xe   :  { %397 = vmatmul.msk.f32.vlgmr.msra.gmra.mxu0 %vm49_vm0, %v40_v7  ;;  %415 = vmatpush.msra.mxu1 %v94_v8  ;;  %v78_v26 = vld [vmem:[%s751_s5 + $0x20] sm:$0xff] }
   0xf   :  { %135 = vmatpush.msrb.mxu0 %v97_v2  ;;  %416 = vmatpush.msra.mxu2 %v94_v8  ;;  %v435_v33 = vld [vmem:[%s750_s4] ss:$0 sm:$0xff]  ;;  %s525_s4 = smov [#allocation5]  }
  0x10   :  { %417 = vmatpush.msra.mxu3 %v94_v8  ;;  %418 = vmatpush.msra.mxu1 %v93_v9  ;;  %s385_s5 = sshll.u32 %s525_s4, 4  ;;  %s386_s5 = int_to_ptr.vmem [resolvable:$true] %s385_s5 }
  0x11   :  { %136 = vmatpush.msrb.mxu0 %v96_v4  ;;  %419 = vmatpush.msra.mxu2 %v93_v9 }
  0x12   :  { %420 = vmatpush.msra.mxu3 %v93_v9  ;;  %421 = vmatpush.msra.mxu1 %v92_v10 }
  0x13   :  { %137 = vmatpush.msrb.mxu0 %v95_v5  ;;  %422 = vmatpush.msra.mxu2 %v92_v10 }
  0x14   :  { %423 = vmatpush.msra.mxu3 %v92_v10  ;;  %424 = vmatpush.msra.mxu1 %v91_v11 }
  0x15   :  { %138 = vmatpush.msrb.mxu0 %v94_v8  ;;  %425 = vmatpush.msra.mxu2 %v91_v11 }
  0x16   :  { %426 = vmatpush.msra.mxu3 %v91_v11  ;;  %427 = vmatpush.msra.mxu1 %v90_v12 }
  0x17   :  { %139 = vmatpush.msrb.mxu0 %v93_v9  ;;  %428 = vmatpush.msra.mxu2 %v90_v12 }
  0x18   :  { %429 = vmatpush.msra.mxu3 %v90_v12 }
  0x19   :  { %140 = vmatpush.msrb.mxu0 %v92_v10 }
  0x1b   :  { %141 = vmatpush.msrb.mxu0 %v91_v11 }
  0x1d   :  { %142 = vmatpush.msrb.mxu0 %v90_v12 }
  0x8b   :  { %v70_v14 = vpop.f32.mrf.mxu0 }
  0x8c   :  { %v71_v15 = vadd.f32 %v434_v13, %v70_v14 }
  0x8e   :  { %v73_v20 = vmax.f32 %v71_v15, 0.0 }
  0x90   :  { %v82_v21 = vmul.f32 %v74_v16, %v73_v20  ;;  %v83_v22 = vmul.f32 %v75_v17, %v73_v20  ;;  %v85_v23 = vmul.f32 %v77_v18, %v73_v20  ;;  %v87_v24 = vmul.f32 %v79_v19, %v73_v20 }
  0x91   :  { %v84_v28 = vmul.f32 %v76_v25, %v73_v20  ;;  %v86_v29 = vmul.f32 %v78_v26, %v73_v20  ;;  %v88_v30 = vmul.f32 %v80_v27, %v73_v20  ;;  %v89_v32 = vmul.f32 %v81_v31, %v73_v20 }
  0x92   :  { %398 = vmatmul.msk.f32.vlgmr.msrb.gmra.mxu0 %vm102_vm1, %v82_v21  ;;  %399 = vmatmul.msk.f32.vlgmr.msra.gmra.mxu1 %vm102_vm1, %v83_v22 }
  0x93   :  { %401 = vmatmul.msk.f32.vlgmr.msra.gmra.mxu2 %vm102_vm1, %v85_v23  ;;  %403 = vmatmul.msk.f32.vlgmr.msra.gmra.mxu3 %vm102_vm1, %v87_v24 }
  0x9a   :  { %400 = vmatmul.msk.f32.gmra.mxu1 %vm102_vm1, %v84_v28 }
  0x9b   :  { %402 = vmatmul.msk.f32.gmra.mxu2 %vm102_vm1, %v86_v29  ;;  %404 = vmatmul.msk.f32.gmra.mxu3 %vm102_vm1, %v88_v30 }
  0xa3   :  { %405 = vmatmul.msk.f32.gmra.mxu3 %vm102_vm1, %v89_v32 }
 0x10f   :  { %v144_v34 = vpop.f32.mrf.mxu0  ;;  %v147_v35 = vpop.f32.mrf.mxu1 }
 0x110   :  { %v145_v36 = vadd.f32 %v435_v33, %v144_v34  ;;  %v148_v38 = vadd.f32 %v435_v33, %v147_v35 }
 0x112   :  { %v169_v37 = vsel %vm168_vm2, %v145_v36, -inf  ;;  %v172_v44 = vsel %vm168_vm2, %v148_v38, -inf }
 0x113   :  { %170 = vmax.xlane.f32.xlu0 %v169_v37 }
 0x116   :  { %v153_v39 = vpop.f32.mrf.mxu2  ;;  %v159_v40 = vpop.f32.mrf.mxu3 }
 0x117   :  { %v150_v41 = vpop.f32.mrf.mxu1  ;;  %v154_v45 = vadd.f32 %v435_v33, %v153_v39  ;;  %v160_v53 = vadd.f32 %v435_v33, %v159_v40 }
 0x118   :  { %v151_v42 = vadd.f32 %v435_v33, %v150_v41 }
 0x119   :  { %v178_v51 = vsel %vm168_vm2, %v154_v45, -inf  ;;  %v184_v56 = vsel %vm168_vm2, %v160_v53, -inf }
 0x11a   :  { %v175_v43 = vsel %vm168_vm2, %v151_v42, -inf }
 0x11b   :  { %176 = vmax.xlane.f32.xlu1 %v175_v43  ;;  %173 = vmax.xlane.f32.xlu0 %v172_v44 }
 0x11e   :  { %v156_v46 = vpop.f32.mrf.mxu2  ;;  %v162_v47 = vpop.f32.mrf.mxu3 }
 0x11f   :  { %v157_v48 = vadd.f32 %v435_v33, %v156_v46  ;;  %v163_v49 = vadd.f32 %v435_v33, %v162_v47 }
 0x121   :  { %v181_v50 = vsel %vm168_vm2, %v157_v48, -inf  ;;  %v187_v52 = vsel %vm168_vm2, %v163_v49, -inf }
 0x122   :  { %182 = vmax.xlane.f32.xlu2 %v181_v50 }
 0x123   :  { %179 = vmax.xlane.f32.xlu1 %v178_v51  ;;  %188 = vmax.xlane.f32.xlu0 %v187_v52 }
 0x126   :  { %v165_v54 = vpop.f32.mrf.mxu3 }
 0x127   :  { %v166_v55 = vadd.f32 %v435_v33, %v165_v54 }
 0x129   :  { %v190_v57 = vsel %vm168_vm2, %v166_v55, -inf }
 0x12a   :  { %185 = vmax.xlane.f32.xlu2 %v184_v56 }
 0x12b   :  { %191 = vmax.xlane.f32.xlu1 %v190_v57 }
 0x186   :  { %v171_v58 = vpop.xlane.xlu0 %170 }
 0x187   :  { %v193_v59 = vsub.f32 %v145_v36, %v171_v58 }
 0x189   :  { %v201_v60 = vmul.f32 1.442695, %v193_v59 }
 0x18b   :  { %436 = vpow2.f32 %v201_v60 }
 0x18e   :  { %v177_v61 = vpop.xlane.xlu1 %176  ;;  %v174_v62 = vpop.xlane.xlu0 %173 }
 0x18f   :  { %v195_v63 = vsub.f32 %v151_v42, %v177_v61  ;;  %v194_v0 = vsub.f32 %v148_v38, %v174_v62 }
 0x191   :  { %v637_v1 = vpop.eup %436  ;;  %v205_v2 = vmul.f32 1.442695, %v195_v63  ;;  %v203_v3 = vmul.f32 1.442695, %v194_v0 }
 0x192   :  { %v217_v4 = vsel %vm168_vm2, %v637_v1, 0.0 }
 0x193   :  { %438 = vpow2.f32 %v205_v2  ;;  %218 = vadd.xlane.f32.xlu2 %v217_v4 }
 0x194   :  { %440 = vpow2.f32 %v203_v3 }
 0x195   :  { %v183_v5 = vpop.xlane.xlu2 %182 }
 0x196   :  { %v197_v6 = vsub.f32 %v157_v48, %v183_v5  ;;  %v180_v7 = vpop.xlane.xlu1 %179  ;;  %v189_v8 = vpop.xlane.xlu0 %188 }
 0x197   :  { %v196_v9 = vsub.f32 %v154_v45, %v180_v7  ;;  %v199_v13 = vsub.f32 %v163_v49, %v189_v8 }
 0x198   :  { %v209_v10 = vmul.f32 1.442695, %v197_v6 }
 0x199   :  { %v641_v11 = vpop.eup %438  ;;  %v207_v12 = vmul.f32 1.442695, %v196_v9  ;;  %v213_v17 = vmul.f32 1.442695, %v199_v13 }
 0x19a   :  { %v643_v14 = vpop.eup %440  ;;  %442 = vpow2.f32 %v209_v10  ;;  %v223_v15 = vsel %vm168_vm2, %v641_v11, 0.0 }
 0x19b   :  { %444 = vpow2.f32 %v207_v12  ;;  %224 = vadd.xlane.f32.xlu1 %v223_v15  ;;  %v220_v16 = vsel %vm168_vm2, %v643_v14, 0.0 }
 0x19c   :  { %221 = vadd.xlane.f32.xlu0 %v220_v16  ;;  %446 = vpow2.f32 %v213_v17 }
 0x19d   :  { %v186_v18 = vpop.xlane.xlu2 %185 }
 0x19e   :  { %v198_v19 = vsub.f32 %v160_v53, %v186_v18  ;;  %v192_v20 = vpop.xlane.xlu1 %191 }
 0x19f   :  { %v200_v21 = vsub.f32 %v166_v55, %v192_v20 }
 0x1a0   :  { %v649_v22 = vpop.eup %442  ;;  %v211_v23 = vmul.f32 1.442695, %v198_v19 }
 0x1a1   :  { %v651_v24 = vpop.eup %444  ;;  %v215_v25 = vmul.f32 1.442695, %v200_v21  ;;  %v229_v27 = vsel %vm168_vm2, %v649_v22, 0.0 }
 0x1a2   :  { %448 = vpow2.f32 %v211_v23  ;;  %v226_v26 = vsel %vm168_vm2, %v651_v24, 0.0  ;;  %v657_v28 = vpop.eup %446 }
 0x1a3   :  { %450 = vpow2.f32 %v215_v25  ;;  %227 = vadd.xlane.f32.xlu2 %v226_v26  ;;  %v235_v33 = vsel %vm168_vm2, %v657_v28, 0.0 }
 0x1a4   :  { %230 = vadd.xlane.f32.xlu0 %v229_v27 }
 0x1a8   :  { %v659_v29 = vpop.eup %448 }
 0x1a9   :  { %v661_v30 = vpop.eup %450  ;;  %v232_v31 = vsel %vm168_vm2, %v659_v29, 0.0 }
 0x1aa   :  { %233 = vadd.xlane.f32.xlu1 %v232_v31  ;;  %v238_v32 = vsel %vm168_vm2, %v661_v30, 0.0 }
 0x1ab   :  { %236 = vadd.xlane.f32.xlu2 %v235_v33 }
 0x1ac   :  { %239 = vadd.xlane.f32.xlu0 %v238_v32 }
 0x206   :  { %v219_v34 = vpop.xlane.xlu2 %218 }
 0x207   :  { %452 = vrcp.f32 %v219_v34  ;;  %v252_v44 = vand.u32 2147483648, %v219_v34  ;;  %vm246_vm4 = vweird.f32 %v219_v34  ;;  %v250_v47 = vand.u32 2147483647, %v219_v34 }
 0x209   :  { %v253_v56 = vor.u32 1.1754944e-38, %v252_v44  ;;  %vm251_vm7 = vcmp.eq.f32.partialorder %v250_v47, 8.507059e+37 }
 0x20d   :  { %v453_v35 = vpop.eup %452 }
 0x20e   :  { %v242_v36 = vmul.f32 %v453_v35, %v219_v34  ;;  %v225_v37 = vpop.xlane.xlu1 %224  ;;  %vm247_vm3 = vweird.f32 %v453_v35 }
 0x20f   :  { %454 = vrcp.f32 %v225_v37  ;;  %v222_v38 = vpop.xlane.xlu0 %221  ;;  %vm674_vm5 = vmor %vm246_vm4, %vm247_vm3  ;;  %v280_v52 = vand.u32 2147483647, %v225_v37  ;;  %v282_v54 = vand.u32 2147483648, %v225_v37  ;;  %vm276_vm9 = vweird.f32 %v225_v37 }
 0x210   :  { %v243_v39 = vsub.f32 1.0, %v242_v36  ;;  %456 = vrcp.f32 %v222_v38  ;;  %v267_v58 = vand.u32 2147483648, %v222_v38  ;;  %v265_v60 = vand.u32 2147483647, %v222_v38 }
 0x211   :  { %vm685_vm11 = vcmp.eq.f32.partialorder %v280_v52, 8.507059e+37  ;;  %v283_v3 = vor.u32 1.1754944e-38, %v282_v54  ;;  %vm261_vm12 = vweird.f32 %v222_v38 }
 0x212   :  { %v244_v40 = vmul.f32 %v453_v35, %v243_v39  ;;  %v268_v7 = vor.u32 1.1754944e-38, %v267_v58  ;;  %vm266_vm14 = vcmp.eq.f32.partialorder %v265_v60, 8.507059e+37 }
 0x214   :  { %v245_v42 = vadd.f32 %v453_v35, %v244_v40 }
 0x215   :  { %v455_v41 = vpop.eup %454 }
 0x216   :  { %v457_v43 = vpop.eup %456  ;;  %v272_v45 = vmul.f32 %v455_v41, %v225_v37  ;;  %v669_v46 = vpop.xlane.xlu2 %227  ;;  %v249_v53 = vsel %vm674_vm5, %v453_v35, %v245_v42  ;;  %vm277_vm6 = vweird.f32 %v455_v41 }
 0x217   :  { %v257_v48 = vmul.f32 %v457_v43, %v222_v38  ;;  %458 = vrcp.f32 %v669_v46  ;;  %v672_v49 = vpop.xlane.xlu0 %230  ;;  %vm262_vm8 = vweird.f32 %v457_v43  ;;  %v254_v61 = vsel %vm251_vm7, %v253_v56, %v249_v53  ;;  %vm681_vm10 = vmor %vm276_vm9, %vm277_vm6 }
 0x218   :  { %v273_v51 = vsub.f32 1.0, %v272_v45  ;;  %460 = vrcp.f32 %v672_v49  ;;  %vm263_vm13 = vmor %vm261_vm12, %vm262_vm8  ;;  %v255_v10 = vmul.f32 %v637_v1, %v254_v61  ;;  %vm291_vm15 = vweird.f32 %v669_v46 }
 0x219   :  { %v258_v55 = vsub.f32 1.0, %v257_v48  ;;  %v295_v17 = vand.u32 2147483647, %v669_v46  ;;  %v297_v21 = vand.u32 2147483648, %v669_v46  ;;  %v310_v1 = vand.u32 2147483647, %v672_v49 }
 0x21a   :  { %v274_v57 = vmul.f32 %v455_v41, %v273_v51  ;;  %v361_v27 = vsel %vm168_vm2, %v255_v10, 0.0  ;;  %vm306_vm1 = vweird.f32 %v672_v49  ;;  %v312_v32 = vand.u32 2147483648, %v672_v49 }
 0x21b   :  { %v259_v59 = vmul.f32 %v457_v43, %v258_v55  ;;  %vm296_vm5 = vcmp.eq.f32.partialorder %v295_v17, 8.507059e+37  ;;  %v298_v36 = vor.u32 1.1754944e-38, %v297_v21  ;;  %vm311_vm6 = vcmp.eq.f32.partialorder %v310_v1, 8.507059e+37 }
 0x21c   :  { %v275_v62 = vadd.f32 %v455_v41, %v274_v57 }
 0x21d   :  { %v459_v63 = vpop.eup %458  ;;  %v260_v4 = vadd.f32 %v457_v43, %v259_v59  ;;  %v689_v5 = vpop.xlane.xlu1 %233 }
 0x21e   :  { %v279_v6 = vsel %vm681_vm10, %v455_v41, %v275_v62  ;;  %v287_v8 = vmul.f32 %v459_v63, %v669_v46  ;;  %462 = vrcp.f32 %v689_v5  ;;  %v461_v9 = vpop.eup %460  ;;  %v697_v13 = vpop.xlane.xlu2 %236  ;;  %vm292_vm0 = vweird.f32 %v459_v63 }
 0x21f   :  { %v264_v12 = vsel %vm263_vm13, %v457_v43, %v260_v4  ;;  %v302_v18 = vmul.f32 %v461_v9, %v672_v49  ;;  %v284_v19 = vsel %vm685_vm11, %v283_v3, %v279_v6  ;;  %464 = vrcp.f32 %v697_v13  ;;  %v707_v26 = vpop.xlane.xlu0 %239  ;;  %vm293_vm4 = vmor %vm291_vm15, %vm292_vm0 }
 0x220   :  { %v269_v15 = vsel %vm266_vm14, %v268_v7, %v264_v12  ;;  %v288_v16 = vsub.f32 1.0, %v287_v8  ;;  %v285_v33 = vmul.f32 %v641_v11, %v284_v19  ;;  %vm307_vm3 = vweird.f32 %v461_v9 }
 0x221   :  { %v270_v20 = vmul.f32 %v643_v14, %v269_v15  ;;  %v303_v25 = vsub.f32 1.0, %v302_v18  ;;  %466 = vrcp.f32 %v707_v26  ;;  %vm308_vm7 = vmor %vm306_vm1, %vm307_vm3  ;;  %v313_v11 = vor.u32 1.1754944e-38, %v312_v32 }
 0x222   :  { %v289_v23 = vmul.f32 %v459_v63, %v288_v16  ;;  %v325_v43 = vand.u32 2147483647, %v689_v5  ;;  %v364_v45 = vsel %vm168_vm2, %v285_v33, 0.0  ;;  %v327_v48 = vand.u32 2147483648, %v689_v5 }
 0x223   :  { %v362_v31 = vsel %vm168_vm2, %v270_v20, 0.0  ;;  %v304_v35 = vmul.f32 %v461_v9, %v303_v25  ;;  %v342_v54 = vand.u32 2147483648, %v697_v13  ;;  %vm321_vm9 = vweird.f32 %v689_v5 }
 0x224   :  { %v463_v14 = vpop.eup %462  ;;  %v290_v34 = vadd.f32 %v459_v63, %v289_v23  ;;  %v363_v38 = vadd.f32 %v362_v31, %v361_v27  ;;  %vm326_vm11 = vcmp.eq.f32.partialorder %v325_v43, 8.507059e+37  ;;  %v328_v59 = vor.u32 1.1754944e-38, %v327_v48 }
 0x225   :  { %v317_v37 = vmul.f32 %v463_v14, %v689_v5  ;;  %v305_v40 = vadd.f32 %v461_v9, %v304_v35  ;;  %v465_v44 = vpop.eup %464  ;;  %vm322_vm8 = vweird.f32 %v463_v14  ;;  %vm336_vm13 = vweird.f32 %v697_v13 }
 0x226   :  { %v294_v39 = vsel %vm293_vm4, %v459_v63, %v290_v34  ;;  %v332_v52 = vmul.f32 %v465_v44, %v697_v13  ;;  %v365_v53 = vadd.f32 %v364_v45, %v363_v38  ;;  %vm323_vm10 = vmor %vm321_vm9, %vm322_vm8  ;;  %vm337_vm12 = vweird.f32 %v465_v44 }
 0x227   :  { %v299_v41 = vsel %vm296_vm5, %v298_v36, %v294_v39  ;;  %v318_v42 = vsub.f32 1.0, %v317_v37  ;;  %v309_v47 = vsel %vm308_vm7, %v461_v9, %v305_v40  ;;  %v467_v55 = vpop.eup %466  ;;  %v340_v63 = vand.u32 2147483647, %v697_v13  ;;  %vm338_vm14 = vmor %vm336_vm13, %vm337_vm12 }
 0x228   :  { %v300_v46 = vmul.f32 %v651_v24, %v299_v41  ;;  %v314_v50 = vsel %vm311_vm6, %v313_v11, %v309_v47  ;;  %v333_v24 = vsub.f32 1.0, %v332_v52  ;;  %v347_v60 = vmul.f32 %v467_v55, %v707_v26 }
 0x229   :  { %v319_v51 = vmul.f32 %v463_v14, %v318_v42  ;;  %v315_v56 = vmul.f32 %v649_v22, %v314_v50  ;;  %v343_v2 = vor.u32 1.1754944e-38, %v342_v54  ;;  %v357_v6 = vand.u32 2147483648, %v707_v26 }
 0x22a   :  { %v366_v49 = vsel %vm168_vm2, %v300_v46, 0.0  ;;  %v334_v62 = vmul.f32 %v465_v44, %v333_v24  ;;  %v348_v22 = vsub.f32 1.0, %v347_v60  ;;  %vm352_vm15 = vweird.f32 %v467_v55 }
 0x22b   :  { %v320_v57 = vadd.f32 %v463_v14, %v319_v51  ;;  %v367_v58 = vadd.f32 %v366_v49, %v365_v53  ;;  %v368_v3 = vsel %vm168_vm2, %v315_v56, 0.0  ;;  %v355_v9 = vand.u32 2147483647, %v707_v26 }
 0x22c   :  { %v335_v5 = vadd.f32 %v465_v44, %v334_v62  ;;  %v349_v8 = vmul.f32 %v467_v55, %v348_v22  ;;  %vm341_vm0 = vcmp.eq.f32.partialorder %v340_v63, 8.507059e+37  ;;  %vm351_vm1 = vweird.f32 %v707_v26 }
 0x22d   :  { %v324_v61 = vsel %vm323_vm10, %v463_v14, %v320_v57  ;;  %v369_v7 = vadd.f32 %v368_v3, %v367_v58  ;;  %vm353_vm3 = vmor %vm351_vm1, %vm352_vm15  ;;  %v358_v17 = vor.u32 1.1754944e-38, %v357_v6  ;;  %vm356_vm4 = vcmp.eq.f32.partialorder %v355_v9, 8.507059e+37 }
 0x22e   :  { %v329_v0 = vsel %vm326_vm11, %v328_v59, %v324_v61  ;;  %v339_v12 = vsel %vm338_vm14, %v465_v44, %v335_v5  ;;  %v350_v16 = vadd.f32 %v467_v55, %v349_v8 }
 0x22f   :  { %v330_v4 = vmul.f32 %v659_v29, %v329_v0  ;;  %v344_v15 = vsel %vm341_vm0, %v343_v2, %v339_v12 }
 0x230   :  { %v345_v29 = vmul.f32 %v657_v28, %v344_v15  ;;  %v354_v18 = vsel %vm353_vm3, %v467_v55, %v350_v16 }
 0x231   :  { %v370_v10 = vsel %vm168_vm2, %v330_v4, 0.0  ;;  %v359_v20 = vsel %vm356_vm4, %v358_v17, %v354_v18 }
 0x232   :  { %v371_v13 = vadd.f32 %v370_v10, %v369_v7  ;;  %v372_v19 = vsel %vm168_vm2, %v345_v29, 0.0  ;;  %v360_v1 = vmul.f32 %v661_v30, %v359_v20 }
 0x234   :  { %v373_v21 = vadd.f32 %v372_v19, %v371_v13  ;;  %v374_v23 = vsel %vm168_vm2, %v360_v1, 0.0 }
 0x236   :  { %v375_v25 = vadd.f32 %v374_v23, %v373_v21 }
 0x238   :  { %v376_v27 = vmul.f32 0.125, %v375_v25 }
 0x23a   :  { %468 = vlog2.f32 %v376_v27 }
 0x240   :  { %v469_v28 = vpop.eup %468 }
 0x241   :  { %v378_v26 = vmul.f32 0.6931472, %v469_v28 }
 0x243   :  { %379 = vst.msk [vmem:[#allocation5] sm:$0xff] %vm168_vm2, %v378_v26 }
 0x244   :  { %390 = dma.vmem_to_hbm [thread:$0]  %s386_s5, 128, %s388_s14, [#allocation4]  }
 0x245   :  { %520 = dma.done.wait [#allocation4], 128  }
 0x246   :  { %521 = vsyncadd [#allocation4], 4294967168 }
 0x247   :  { %395 = vsyncpa [#allocation3], 1 }
 0x248   :  { %396 = vsyncpa [#allocation4], 1 }

</bundles_post_ra>
